<compile_context>
chip_gen: v6e
topology: v6e:2x2x1
jax: 0.10.0
libtpu: 0.0.40
codegen_flags: <defaults>
</compile_context>

<pallas_src>
import functools
import numpy as np
import jax
import jax.numpy as jnp
from jax import lax
from jax.experimental import pallas as pl
from jax.experimental.pallas import tpu as pltpu

PAD = 0
LN_EPS = 1e-5          # nn.LayerNorm default
NEG_INF = -1e30
ROW_TILE = 256         # row tile for the (B*L, .) slab kernels


# ----------------------------------------------------------------------------
# Sinusoid position table (same math as the PyTorch helper)
# ----------------------------------------------------------------------------
def get_sinusoid_encoding_table(n_position, d_hid, padding_idx=None):
    def cal_angle(position, hid_idx):
        return position / np.power(10000, 2 * (hid_idx // 2) / d_hid)

    table = np.array(
        [[cal_angle(pos, j) for j in range(d_hid)] for pos in range(n_position)],
        dtype=np.float64,
    )
    table[:, 0::2] = np.sin(table[:, 0::2])
    table[:, 1::2] = np.cos(table[:, 1::2])
    if padding_idx is not None:
        table[padding_idx] = 0.0
    return np.asarray(table, dtype=np.float32)


# ----------------------------------------------------------------------------
# Pallas kernels
# ----------------------------------------------------------------------------
def _linear_kernel(x_ref, w_ref, b_ref, o_ref):
    # o = x @ w + b      x:(TM,K) w:(K,N) b:(1,N)
    o_ref[...] = (
        jnp.dot(x_ref[...], w_ref[...], preferred_element_type=jnp.float32)
        + b_ref[...]
    )


def _proj_ln_kernel(x_ref, w_ref, bp_ref, r_ref, g_ref, b_ref, m_ref, o_ref):
    # o = LayerNorm(x@w + bp + residual) * g + b, then * non_pad_mask
    y = (jnp.dot(x_ref[...], w_ref[...], preferred_element_type=jnp.float32)
         + bp_ref[...] + r_ref[...])
    mean = jnp.mean(y, axis=-1, keepdims=True)
    cen = y - mean
    var = jnp.mean(cen * cen, axis=-1, keepdims=True)
    y = cen * lax.rsqrt(var + LN_EPS) * g_ref[...] + b_ref[...]
    o_ref[...] = y * m_ref[...]


def _ffn_ln_kernel(x_ref, w1_ref, b1_ref, w2_ref, b2_ref, g_ref, b_ref, m_ref, o_ref):
    # o = (LayerNorm(relu(x@w1+b1)@w2 + b2 + x) * g + b) * non_pad_mask
    x = x_ref[...]
    h = jnp.maximum(
        jnp.dot(x, w1_ref[...], preferred_element_type=jnp.float32) + b1_ref[...], 0.0)
    y = jnp.dot(h, w2_ref[...], preferred_element_type=jnp.float32) + b2_ref[...] + x
    mean = jnp.mean(y, axis=-1, keepdims=True)
    cen = y - mean
    var = jnp.mean(cen * cen, axis=-1, keepdims=True)
    y = cen * lax.rsqrt(var + LN_EPS) * g_ref[...] + b_ref[...]
    o_ref[...] = y * m_ref[...]


def _mha_attn_kernel(q_ref, k_ref, v_ref, bias_ref, o_ref, *, n_head, d_k, d_v, inv_temp):
    # One batch element per grid step, ALL heads inside the kernel.
    # q:(Lq,H*dk) k:(Lk,H*dk) v:(Lk,H*dv) bias:(Lq,Lk) -> o:(Lq,H*dv)
    q = q_ref[0]
    k = k_ref[0]
    v = v_ref[0]
    bias = bias_ref[0]
    outs = []
    for h in range(n_head):
        qh = q[:, h * d_k:(h + 1) * d_k]
        kh = k[:, h * d_k:(h + 1) * d_k]
        vh = v[:, h * d_v:(h + 1) * d_v]
        s = lax.dot_general(qh, kh, (((1,), (1,)), ((), ())),
                            preferred_element_type=jnp.float32)
        s = s * inv_temp + bias
        s = s - jnp.max(s, axis=-1, keepdims=True)
        p = jnp.exp(s)
        p = p * pl.reciprocal(jnp.sum(p, axis=-1, keepdims=True), approx=True)
        outs.append(jnp.dot(p, vh, preferred_element_type=jnp.float32))
    # single lane-dense store of the full (Lq, H*dv) slab
    o_ref[0] = jnp.concatenate(outs, axis=-1)


# ----------------------------------------------------------------------------
# Pallas wrappers
# ----------------------------------------------------------------------------
def _row_tile(M):
    return M if M <= ROW_TILE else ROW_TILE


def linear_pallas(x2d, w, b):
    M, K = x2d.shape
    N = w.shape[1]
    TM = _row_tile(M)
    return pl.pallas_call(
        _linear_kernel,
        out_shape=jax.ShapeDtypeStruct((M, N), jnp.float32),
        grid=(pl.cdiv(M, TM),),
        in_specs=[
            pl.BlockSpec((TM, K), lambda i: (i, 0)),
            pl.BlockSpec((K, N), lambda i: (0, 0)),
            pl.BlockSpec((1, N), lambda i: (0, 0)),
        ],
        out_specs=pl.BlockSpec((TM, N), lambda i: (i, 0)),
        compiler_params=pltpu.CompilerParams(dimension_semantics=("parallel",)),
    )(x2d, w, b)


def proj_ln_pallas(x2d, w, bp, res2d, g, b, m2d):
    M, K = x2d.shape
    D = w.shape[1]
    TM = _row_tile(M)
    return pl.pallas_call(
        _proj_ln_kernel,
        out_shape=jax.ShapeDtypeStruct((M, D), jnp.float32),
        grid=(pl.cdiv(M, TM),),
        in_specs=[
            pl.BlockSpec((TM, K), lambda i: (i, 0)),
            pl.BlockSpec((K, D), lambda i: (0, 0)),
            pl.BlockSpec((1, D), lambda i: (0, 0)),
            pl.BlockSpec((TM, D), lambda i: (i, 0)),
            pl.BlockSpec((1, D), lambda i: (0, 0)),
            pl.BlockSpec((1, D), lambda i: (0, 0)),
            pl.BlockSpec((TM, 1), lambda i: (i, 0)),
        ],
        out_specs=pl.BlockSpec((TM, D), lambda i: (i, 0)),
        compiler_params=pltpu.CompilerParams(dimension_semantics=("parallel",)),
    )(x2d, w, bp, res2d, g, b, m2d)


def ffn_ln_pallas(x2d, w1, b1, w2, b2, g, b, m2d):
    M, D = x2d.shape
    H = w1.shape[1]
    TM = _row_tile(M)
    return pl.pallas_call(
        _ffn_ln_kernel,
        out_shape=jax.ShapeDtypeStruct((M, D), jnp.float32),
        grid=(pl.cdiv(M, TM),),
        in_specs=[
            pl.BlockSpec((TM, D), lambda i: (i, 0)),
            pl.BlockSpec((D, H), lambda i: (0, 0)),
            pl.BlockSpec((1, H), lambda i: (0, 0)),
            pl.BlockSpec((H, D), lambda i: (0, 0)),
            pl.BlockSpec((1, D), lambda i: (0, 0)),
            pl.BlockSpec((1, D), lambda i: (0, 0)),
            pl.BlockSpec((1, D), lambda i: (0, 0)),
            pl.BlockSpec((TM, 1), lambda i: (i, 0)),
        ],
        out_specs=pl.BlockSpec((TM, D), lambda i: (i, 0)),
        compiler_params=pltpu.CompilerParams(dimension_semantics=("parallel",)),
    )(x2d, w1, b1, w2, b2, g, b, m2d)


def attention_pallas(q, k, v, bias, n_head, d_k, d_v, temp):
    B, Lq, HDk = q.shape
    Lk = k.shape[1]
    HDv = v.shape[2]
    kern = functools.partial(_mha_attn_kernel, n_head=n_head, d_k=d_k, d_v=d_v,
                             inv_temp=1.0 / float(temp))
    return pl.pallas_call(
        kern,
        out_shape=jax.ShapeDtypeStruct((B, Lq, HDv), jnp.float32),
        grid=(B,),
        in_specs=[
            pl.BlockSpec((1, Lq, HDk), lambda b: (b, 0, 0)),
            pl.BlockSpec((1, Lk, HDk), lambda b: (b, 0, 0)),
            pl.BlockSpec((1, Lk, HDv), lambda b: (b, 0, 0)),
            pl.BlockSpec((1, Lq, Lk), lambda b: (b, 0, 0)),
        ],
        out_specs=pl.BlockSpec((1, Lq, HDv), lambda b: (b, 0, 0)),
        compiler_params=pltpu.CompilerParams(dimension_semantics=("parallel",)),
    )(q, k, v, bias)


# ----------------------------------------------------------------------------
# Decoder layer (Pallas path)
# ----------------------------------------------------------------------------
def decoder_layer_pallas(dec_out, enc_out, slf_mask, enc_mask, non_pad_mask,
                         lp, n_head, d_k, d_v):
    B, Lq, Dm = dec_out.shape
    Ls = enc_out.shape[1]
    M = B * Lq
    Me = B * Ls
    HDk = n_head * d_k
    HDv = n_head * d_v
    temp = np.sqrt(d_k)
    npm2d = non_pad_mask.reshape(M, 1)

    # ---- masked self-attention (fused QKV, fused out-proj+LN+mask) ----------
    slf = lp["slf"]
    x2d = dec_out.reshape(M, Dm)
    qkv = linear_pallas(x2d, slf["wqkv"], slf["bqkv"])          # (M, 2*HDk+HDv)
    q = qkv[:, :HDk].reshape(B, Lq, HDk)
    k = qkv[:, HDk:2 * HDk].reshape(B, Lq, HDk)
    v = qkv[:, 2 * HDk:].reshape(B, Lq, HDv)
    slf_bias = slf_mask * jnp.float32(NEG_INF)
    attn = attention_pallas(q, k, v, slf_bias, n_head, d_k, d_v, temp)
    x1 = proj_ln_pallas(attn.reshape(M, HDv), slf["wo"], slf["bo"],
                        x2d, slf["g"], slf["b"], npm2d)          # (M, Dm)

    # ---- encoder-decoder attention ------------------------------------------
    enc = lp["enc"]
    e2d = enc_out.reshape(Me, Dm)
    q2 = linear_pallas(x1, enc["wq"], enc["bq"]).reshape(B, Lq, HDk)
    kv = linear_pallas(e2d, enc["wkv"], enc["bkv"])              # (Me, HDk+HDv)
    k2 = kv[:, :HDk].reshape(B, Ls, HDk)
    v2 = kv[:, HDk:].reshape(B, Ls, HDv)
    enc_bias = enc_mask * jnp.float32(NEG_INF)
    attn2 = attention_pallas(q2, k2, v2, enc_bias, n_head, d_k, d_v, temp)
    x2 = proj_ln_pallas(attn2.reshape(M, HDv), enc["wo"], enc["bo"],
                        x1, enc["g"], enc["b"], npm2d)

    # ---- position-wise FFN (fused with residual+LN+mask) ---------------------
    f = lp["ffn"]
    x3 = ffn_ln_pallas(x2, f["w1"], f["b1"], f["w2"], f["b2"],
                       f["g"], f["b"], npm2d)
    return x3.reshape(B, Lq, Dm)


# ----------------------------------------------------------------------------
# Pure-JAX reference (for correctness check)
# ----------------------------------------------------------------------------
def _layer_norm_ref(x, g, b):
    mean = jnp.mean(x, -1, keepdims=True)
    var = jnp.mean((x - mean) ** 2, -1, keepdims=True)
    return (x - mean) * lax.rsqrt(var + LN_EPS) * g + b


def mha_ref(q_in, k_in, v_in, mask, p, n_head, d_k, d_v):
    B, Lq, Dm = q_in.shape
    Lk = k_in.shape[1]
    residual = q_in
    q = (q_in @ p["wq"] + p["bq"]).reshape(B, Lq, n_head, d_k).transpose(2, 0, 1, 3).reshape(n_head * B, Lq, d_k)
    k = (k_in @ p["wk"] + p["bk"]).reshape(B, Lk, n_head, d_k).transpose(2, 0, 1, 3).reshape(n_head * B, Lk, d_k)
    v = (v_in @ p["wv"] + p["bv"]).reshape(B, Lk, n_head, d_v).transpose(2, 0, 1, 3).reshape(n_head * B, Lk, d_v)
    m = jnp.tile(mask.astype(jnp.float32), (n_head, 1, 1))
    s = jnp.einsum("bqd,bkd->bqk", q, k) / np.sqrt(d_k)
    s = jnp.where(m > 0.0, NEG_INF, s)
    a = jax.nn.softmax(s, axis=-1)
    o = jnp.einsum("bqk,bkd->bqd", a, v)
    o = o.reshape(n_head, B, Lq, d_v).transpose(1, 2, 0, 3).reshape(B, Lq, n_head * d_v)
    o = o @ p["wo"] + p["bo"]
    return _layer_norm_ref(o + residual, p["g"], p["b"])


def ffn_ref(x, p):
    h = jnp.maximum(x @ p["w1"] + p["b1"], 0.0)
    o = h @ p["w2"] + p["b2"]
    return _layer_norm_ref(o + x, p["g"], p["b"])


def decoder_layer_ref(dec_out, enc_out, slf_mask, enc_mask, non_pad_mask,
                      lp, n_head, d_k, d_v):
    out = mha_ref(dec_out, dec_out, dec_out, slf_mask, lp["slf"], n_head, d_k, d_v)
    out = out * non_pad_mask
    out = mha_ref(out, enc_out, enc_out, enc_mask, lp["enc"], n_head, d_k, d_v)
    out = out * non_pad_mask
    out = ffn_ref(out, lp["ffn"]) * non_pad_mask
    return out


# ----------------------------------------------------------------------------
# Decoder forward (mask construction + embedding lookup are JAX glue)
# ----------------------------------------------------------------------------
def decoder_forward(params, tgt_seq, tgt_pos, src_seq, enc_output,
                    n_head, d_k, d_v, layer_fn):
    B, Lq = tgt_seq.shape
    Ls = src_seq.shape[1]

    non_pad_mask = (tgt_seq != PAD).astype(jnp.float32)[:, :, None]          # (B,Lq,1)
    subseq = jnp.triu(jnp.ones((Lq, Lq), jnp.int32), 1)[None, :, :]           # (1,Lq,Lq)
    keypad = (tgt_seq == PAD).astype(jnp.int32)[:, None, :]                   # (B,1,Lq)
    slf_attn_mask = ((keypad + subseq) > 0).astype(jnp.float32)               # (B,Lq,Lq)
    dec_enc_mask = jnp.broadcast_to(
        (src_seq == PAD).astype(jnp.float32)[:, None, :], (B, Lq, Ls))        # (B,Lq,Ls)

    dec_output = (jnp.take(params["word_emb"], tgt_seq, axis=0)
                  + jnp.take(params["pos_table"], tgt_pos, axis=0))

    for lp in params["layers"]:
        dec_output = layer_fn(dec_output, enc_output, slf_attn_mask,
                              dec_enc_mask, non_pad_mask, lp, n_head, d_k, d_v)
    return dec_output


# ----------------------------------------------------------------------------
# Deterministic parameter init (stores both separate and fused projections)
# ----------------------------------------------------------------------------
def init_params(key, n_tgt_vocab, n_position, d_word_vec, n_layers,
                n_head, d_k, d_v, d_model, d_inner):
    def w(k, shape, s=0.05):
        return jax.random.normal(k, shape, jnp.float32) * s

    keys = jax.random.split(key, n_layers + 1)
    word_emb = w(keys[0], (n_tgt_vocab, d_word_vec)).at[PAD].set(0.0)
    pos_table = jnp.asarray(get_sinusoid_encoding_table(n_position, d_word_vec, padding_idx=0))

    def attn_p(k):
        kk = jax.random.split(k, 4)
        p = dict(
            wq=w(kk[0], (d_model, n_head * d_k)), bq=jnp.zeros((1, n_head * d_k), jnp.float32),
            wk=w(kk[1], (d_model, n_head * d_k)), bk=jnp.zeros((1, n_head * d_k), jnp.float32),
            wv=w(kk[2], (d_model, n_head * d_v)), bv=jnp.zeros((1, n_head * d_v), jnp.float32),
            wo=w(kk[3], (n_head * d_v, d_model)), bo=jnp.zeros((1, d_model), jnp.float32),
            g=jnp.ones((1, d_model), jnp.float32), b=jnp.zeros((1, d_model), jnp.float32),
        )
        # fused views used by the Pallas path (single QKV / KV matmul)
        p["wqkv"] = jnp.concatenate([p["wq"], p["wk"], p["wv"]], axis=1)
        p["bqkv"] = jnp.concatenate([p["bq"], p["bk"], p["bv"]], axis=1)
        p["wkv"] = jnp.concatenate([p["wk"], p["wv"]], axis=1)
        p["bkv"] = jnp.concatenate([p["bk"], p["bv"]], axis=1)
        return p

    layers = []
    for l in range(n_layers):
        lk = jax.random.split(keys[1 + l], 4)
        layers.append(dict(
            slf=attn_p(lk[0]),
            enc=attn_p(lk[1]),
            ffn=dict(
                w1=w(lk[2], (d_model, d_inner)), b1=jnp.zeros((1, d_inner), jnp.float32),
                w2=w(lk[3], (d_inner, d_model)), b2=jnp.zeros((1, d_model), jnp.float32),
                g=jnp.ones((1, d_model), jnp.float32), b=jnp.zeros((1, d_model), jnp.float32),
            ),
        ))
    return dict(word_emb=word_emb, pos_table=pos_table, layers=layers)


# ----------------------------------------------------------------------------
if __name__ == "__main__":
    key = jax.random.PRNGKey(0)
    n_tgt_vocab, len_max_seq = 16, 12
    d_word_vec = d_model = 32
    n_layers, n_head, d_k, d_v, d_inner = 2, 2, 16, 16, 64
    B, Lq, Ls = 2, 8, 10

    ks = jax.random.split(key, 4)

    # target sequence (with a padded tail on the second example)
    tgt_tok = jax.random.randint(ks[0], (B, Lq), 1, n_tgt_vocab)
    tgt_len = jnp.array([Lq, Lq - 3])
    pos_idx = jnp.arange(1, Lq + 1)[None, :]
    tgt_valid = pos_idx <= tgt_len[:, None]
    tgt_seq = jnp.where(tgt_valid, tgt_tok, PAD).astype(jnp.int32)
    tgt_pos = jnp.where(tgt_valid, pos_idx, 0).astype(jnp.int32)

    # source sequence (with padding) + encoder output
    src_tok = jax.random.randint(ks[1], (B, Ls), 1, n_tgt_vocab)
    src_len = jnp.array([Ls, Ls - 2])
    src_valid = jnp.arange(1, Ls + 1)[None, :] <= src_len[:, None]
    src_seq = jnp.where(src_valid, src_tok, PAD).astype(jnp.int32)
    enc_output = jax.random.normal(ks[2], (B, Ls, d_model), jnp.float32)

    params = init_params(ks[3], n_tgt_vocab, len_max_seq + 1, d_word_vec,
                         n_layers, n_head, d_k, d_v, d_model, d_inner)

    out = decoder_forward(params, tgt_seq, tgt_pos, src_seq, enc_output,
                          n_head, d_k, d_v, decoder_layer_pallas)
    out = jax.block_until_ready(out)

    ref = decoder_forward(params, tgt_seq, tgt_pos, src_seq, enc_output,
                          n_head, d_k, d_v, decoder_layer_ref)
    ref = jax.block_until_ready(ref)

    assert out.shape == (B, Lq, d_model)
    # tolerance slightly loosened vs the exact-reciprocal version because the
    # softmax denominator now uses the approximate EUP reciprocal.
    assert np.allclose(np.asarray(out), np.asarray(ref), atol=2e-3, rtol=2e-3), (
        "Pallas decoder output mismatch vs pure-JAX reference")

    # TODO(synk): dropout layers are identity here (eval-mode semantics).
    print("KERNEL_OK")
</pallas_src>

<mosaic_0001>
module attributes {stable_mosaic.version = 11 : i64} {
  func.func @_linear_kernel(%arg0: i32, %arg1: memref<16x32xf32, #tpu.memory_space<vmem>>, %arg2: memref<32x96xf32, #tpu.memory_space<vmem>>, %arg3: memref<1x96xf32, #tpu.memory_space<vmem>>, %arg4: memref<16x96xf32, #tpu.memory_space<vmem>>) attributes {dimension_semantics = [#tpu.dimension_semantics<parallel>], iteration_bounds = array<i64: 1>, scalar_prefetch = 0 : i64, scratch_operands = 0 : i64, tpu.core_type = #tpu.core_type<tc>, window_params = [{transform_indices = @transform_0, window_bounds = array<i64: 16, 32>}, {pipeline_mode = #tpu.pipeline_mode<synchronous>, transform_indices = @transform_1, window_bounds = array<i64: 32, 96>}, {pipeline_mode = #tpu.pipeline_mode<synchronous>, transform_indices = @transform_2, window_bounds = array<i64: 1, 96>}, {transform_indices = @transform_3, window_bounds = array<i64: 16, 96>}]} {
    %c0 = arith.constant 0 : index
    %c0_0 = arith.constant 0 : index
    %0 = vector.load %arg1[%c0, %c0_0] : memref<16x32xf32, #tpu.memory_space<vmem>>, vector<16x32xf32>
    %c0_1 = arith.constant 0 : index
    %c0_2 = arith.constant 0 : index
    %1 = vector.load %arg2[%c0_1, %c0_2] : memref<32x96xf32, #tpu.memory_space<vmem>>, vector<32x96xf32>
    %cst = arith.constant dense<0.000000e+00> : vector<16x96xf32>
    %2 = tpu.matmul %0, %1, %cst {dimension_numbers = #tpu.dot_dimension_numbers<[1], [0], [0], [1], [0, 0, 1, 1], [], []>} : vector<16x32xf32>, vector<32x96xf32>, vector<16x96xf32> -> vector<16x96xf32>
    %c0_3 = arith.constant 0 : index
    %c0_4 = arith.constant 0 : index
    %3 = vector.load %arg3[%c0_3, %c0_4] : memref<1x96xf32, #tpu.memory_space<vmem>>, vector<1x96xf32>
    %4 = vector.broadcast %3 : vector<1x96xf32> to vector<16x96xf32>
    %5 = arith.addf %2, %4 : vector<16x96xf32>
    %c0_5 = arith.constant 0 : index
    %c0_6 = arith.constant 0 : index
    %6 = vector.load %arg4[%c0_5, %c0_6] : memref<16x96xf32, #tpu.memory_space<vmem>>, vector<16x96xf32>
    tpu.vector_store %arg4[%c0_5, %c0_6], %5 {strides = array<i32>} : memref<16x96xf32, #tpu.memory_space<vmem>>, vector<16x96xf32>,
    return
  }
  func.func @transform_0(%arg0: i32) -> (i32, i32) {
    %c0_i32 = arith.constant 0 : i32
    %c0_i32_0 = arith.constant 0 : i32
    return %arg0, %c0_i32 : i32, i32
  }
  func.func @transform_1(%arg0: i32) -> (i32, i32) {
    %c0_i32 = arith.constant 0 : i32
    %c0_i32_0 = arith.constant 0 : i32
    %c0_i32_1 = arith.constant 0 : i32
    return %c0_i32, %c0_i32_0 : i32, i32
  }
  func.func @transform_2(%arg0: i32) -> (i32, i32) {
    %c0_i32 = arith.constant 0 : i32
    %c0_i32_0 = arith.constant 0 : i32
    %c0_i32_1 = arith.constant 0 : i32
    return %c0_i32, %c0_i32_0 : i32, i32
  }
  func.func @transform_3(%arg0: i32) -> (i32, i32) {
    %c0_i32 = arith.constant 0 : i32
    %c0_i32_0 = arith.constant 0 : i32
    return %arg0, %c0_i32 : i32, i32
  }
}

</mosaic_0001>

<bundles_post_ra>
// kernel: tpu_custom_call.1
= control target key start
LH: loop header
LB: loop body
LE: loop exit
PB: predicated region body
PF: predicated region fallthrough
CT: control target
= control target key end

     0   :  { %8 = vsyncpa [#allocation3], 0  ;;  %s298_s0 = inlined_call_operand.hbm [shape: f32[16,32], index: 0, kind: input, shape index: {}]   ;;  %s299_s1 = inlined_call_operand.hbm [shape: f32[32,96], index: 1, kind: input, shape index: {}]   ;;  %s300_s2 = inlined_call_operand.vmem [shape: f32[1,96], index: 2, kind: input, shape index: {}]   ;;  %s301_s3 = inlined_call_operand.hbm [shape: f32[16,96], index: 3, kind: output, shape index: {}]  }
   0x1   :  { %9 = vsyncpa [#allocation6], 0 }
   0x2   :  { %10 = vsyncpa [#allocation4], 0  ;;  %s250_s12 = smov [#allocation2]  }
   0x3   :  { %s16_s13 = sshll.u32 %s250_s12, 4  ;;  %s17_s13 = int_to_ptr.vmem [resolvable:$true] %s16_s13 }
   0x4   :  { %s192_s14 = scalar_lea.vmem %s17_s13, 256  ;;  %p197_p1 = scmp.lt.s32.totalorder %s17_s13, %s17_s13 }
   0x5   :  { %p193_p0 = scmp.ne.s32.totalorder %s17_s13, %s192_s14  ;;  %p198_p2 = scmp.lt.s32.totalorder %s192_s14, %s192_s14 }
   0x7   :  { %p199_p3 = por %p198_p2, %p197_p1 }
   0x9   :  { %p200_p4 = pnand %p199_p3, %p193_p0 }
   0xb   :  { %203 = shalt.err (!%p200_p4)
}
   0xc   :  { %s251_s15 = smov 128   ;;  %s252_s16 = smov 8  }
   0xd   :  { %22 = dma.hbm_to_vmem [thread:$0]  %s298_s0, 256, %s17_s13, [#allocation3], %s251_s15, %s251_s15, %s252_s16  }
   0xe   :  { %s253_s19 = smov [#allocation5]  }
   0xf   :  { %s28_s20 = sshll.u32 %s253_s19, 4  ;;  %s29_s20 = int_to_ptr.vmem [resolvable:$true] %s28_s20 }
  0x10   :  { %s212_s21 = scalar_lea.vmem %s29_s20, 512  ;;  %p217_p6 = scmp.lt.s32.totalorder %s29_s20, %s29_s20 }
  0x11   :  { %p213_p5 = scmp.ne.s32.totalorder %s29_s20, %s212_s21  ;;  %p218_p7 = scmp.lt.s32.totalorder %s212_s21, %s212_s21 }
  0x13   :  { %p219_p8 = por %p218_p7, %p217_p6 }
  0x15   :  { %p220_p9 = pnand %p219_p8, %p213_p5 }
  0x17   :  { %223 = shalt.err (!%p220_p9)
}
  0x18   :  { %34 = dma.hbm_to_vmem [thread:$0]  %s299_s1, 512, %s29_s20, [#allocation6], %s251_s15, %s251_s15, %s252_s16  }
  0x19   :  { %244 = dma.done.wait [#allocation3], 256  }
  0x1a   :  { %245 = vsyncadd [#allocation3], 4294967040 }
  0x1b   :  { %246 = dma.done.wait [#allocation6], 512  }
  0x1c   :  { %247 = vsyncadd [#allocation6], 4294966784  ;;  %vm56_vm0 = vcmask 261120   ;;  %v48_v0 = vld [vmem:[#allocation5 + $0x18] sm:$0xff]  ;;  %v47_v1 = vld [vmem:[#allocation5 + $0x10] sm:$0xff]  ;;  %vm138_vm1 = vcmask 785408  }
  0x1d   :  { %168 = vmatprep.subr.mxu0 %v48_v0  ;;  %v43_v2 = vld [vmem:[#allocation2] sm:$0xff]  ;;  %v46_v3 = vld [vmem:[#allocation5 + $0x8] sm:$0xff]  ;;  %v45_v4 = vld [vmem:[#allocation5] sm:$0xff]  ;;  %s254_s24 = smov [#allocation7]  }
  0x1e   :  { %169 = vmatpush3.msra.mxu0 %v48_v0  ;;  %176 = vmatprep.mubr.msk.f32.mxu0 %vm56_vm0, %v43_v2  ;;  %v44_v5 = vld [vmem:[#allocation2 + $0x8] sm:$0xff]  ;;  %v159_v6 = vld [vmem:[%s300_s2] ss:$0 sm:$0xff]  ;;  %s146_s25 = sshll.u32 %s254_s24, 4  ;;  %s147_s25 = int_to_ptr.vmem [resolvable:$true] %s146_s25 }
  0x1f   :  { %170 = vmatprep.subr.mxu0 %v47_v1  ;;  %s224_s26 = scalar_lea.vmem %s147_s25, 256  ;;  %p229_p11 = scmp.lt.s32.totalorder %s147_s25, %s147_s25 }
  0x20   :  { %171 = vmatpush3.msra.mxu0 %v47_v1  ;;  %p225_p10 = scmp.ne.s32.totalorder %s147_s25, %s224_s26  ;;  %p230_p12 = scmp.lt.s32.totalorder %s224_s26, %s224_s26 }
  0x21   :  { %172 = vmatprep.subr.mxu0 %v46_v3 }
  0x22   :  { %173 = vmatpush3.msra.mxu0 %v46_v3  ;;  %p231_p13 = por %p230_p12, %p229_p11 }
  0x23   :  { %174 = vmatprep.subr.mxu0 %v45_v4 }
  0x24   :  { %175 = vmatpush3.msra.mxu0 %v45_v4  ;;  %p232_p0 = pnand %p231_p13, %p225_p10 }
  0x25   :  { %177 = vmatmul.mubr.msk.f32.vlgmr.msra.gmra.mxu0 %vm56_vm0, %v44_v5 }
  0xe5   :  { %v178_v7 = vpop.f32.mrf.mxu0 }
  0xe6   :  { %v135_v8 = vadd.f32 %v178_v7, %v159_v6 }
  0xe7   :  { %v129_v9 = vpop.f32.mrf.mxu0 }
  0xe8   :  { %v130_v10 = vadd.f32 %v159_v6, %v129_v9  ;;  %140 = vst.msk [vmem:[#allocation7 + $0x8] sm:$0xff] %vm138_vm1, %v135_v8 }
  0xea   :  { %139 = vst.msk [vmem:[#allocation7] sm:$0xff] %vm138_vm1, %v130_v10 }
  0xeb   :  { %235 = shalt.err (!%p232_p0)
}
  0xec   :  { %152 = dma.vmem_to_hbm [thread:$0]  %s147_s25, 256, %s301_s3, [#allocation4], %s251_s15, %s251_s15, %s252_s16  }
  0xed   :  { %248 = dma.done.wait [#allocation4], 256  }
  0xee   :  { %249 = vsyncadd [#allocation4], 4294967040 }
  0xef   :  { %156 = vsyncpa [#allocation3], 1 }
  0xf0   :  { %157 = vsyncpa [#allocation6], 1 }
  0xf1   :  { %158 = vsyncpa [#allocation4], 1 }

</bundles_post_ra>
